<compile_context>
chip_gen: v7x
topology: tpu7x:2x2x1
jax: 0.10.0
libtpu: 0.0.40
codegen_flags: <defaults>
</compile_context>

<pallas_src>
import jax
import jax.numpy as jnp
from jax.experimental import pallas as pl
from jax.experimental.pallas import tpu as pltpu

IN_F = 10
HID_F = 16
OUT_F = 1  # `other`


def _round_up(n, m):
    return ((n + m - 1) // m) * m


def _fused_mlp_kernel(x_ref, wf_ref, o_ref):
    # x_ref : (TB, IN_F)    VMEM
    # wf_ref: (IN_F, HID_F) VMEM (resident across grid steps)
    # o_ref : (TB, HID_F)   VMEM
    o_ref[...] = jnp.dot(
        x_ref[...], wf_ref[...], preferred_element_type=jnp.float32
    ).astype(o_ref.dtype)


def fused_mlp(x, w1, w2, *, tb=512):
    """x: (B, IN_F) f32; w1: (HID_F, IN_F); w2: (OUT_F, HID_F). Returns (B, HID_F)."""
    B = x.shape[0]

    # --- Fold linear2 + broadcast-add into linear1 (tiny 10x16 precompute) ---
    # M[k, j] = w2[0, k] + delta(k, j)   -> (HID_F, HID_F)
    m = w2.astype(jnp.float32).T * jnp.ones((1, HID_F), jnp.float32) + jnp.eye(
        HID_F, dtype=jnp.float32
    )
    # W_fused = W1^T @ M -> (IN_F, HID_F); done once in XLA, not per grid step.
    w_fused = w1.astype(jnp.float32).T @ m

    # --- Batch tiling: keep sublane-aligned, pad tail rows with zeros ---
    tb = min(tb, _round_up(B, 8))
    b_pad = _round_up(B, tb)
    if b_pad != B:
        x = jnp.pad(x, ((0, b_pad - B), (0, 0)))
    grid = (b_pad // tb,)

    out = pl.pallas_call(
        _fused_mlp_kernel,
        out_shape=jax.ShapeDtypeStruct((b_pad, HID_F), jnp.float32),
        grid=grid,
        in_specs=[
            pl.BlockSpec((tb, IN_F), lambda i: (i, 0), memory_space=pltpu.VMEM),
            pl.BlockSpec((IN_F, HID_F), lambda i: (0, 0), memory_space=pltpu.VMEM),
        ],
        out_specs=pl.BlockSpec((tb, HID_F), lambda i: (i, 0), memory_space=pltpu.VMEM),
        compiler_params=pltpu.CompilerParams(
            dimension_semantics=("parallel",),   # v7x: shard batch tiles across 2 TCs
            vmem_limit_bytes=32 * 1024 * 1024,   # safe on v5e/v6e/v7x (64 MiB physical)
        ),
        cost_estimate=pl.CostEstimate(
            flops=2 * b_pad * IN_F * HID_F,
            transcendentals=0,
            bytes_accessed=4 * (b_pad * IN_F + IN_F * HID_F + b_pad * HID_F),
        ),
    )(x, w_fused)

    return out[:B]


def init_params(key):
    # PyTorch-default-like init: U(-1/sqrt(fan_in), 1/sqrt(fan_in))
    k1, k2 = jax.random.split(key)
    bound1 = 1.0 / (IN_F ** 0.5)
    bound2 = 1.0 / (HID_F ** 0.5)
    w1 = jax.random.uniform(k1, (HID_F, IN_F), jnp.float32, -bound1, bound1)
    w2 = jax.random.uniform(k2, (OUT_F, HID_F), jnp.float32, -bound2, bound2)
    return w1, w2


if __name__ == "__main__":
    key = jax.random.PRNGKey(0)
    kx, kp = jax.random.split(key)

    B = 8
    x = jax.random.normal(kx, (B, IN_F), jnp.float32)
    w1, w2 = init_params(kp)

    out = fused_mlp(x, w1, w2)
    out = jax.block_until_ready(out)

    # Reference: same math as the PyTorch module (unfused).
    h_ref = x @ w1.T                       # (B, 16)
    ref = (h_ref @ w2.T) + h_ref           # (B, 1) + (B, 16) broadcast -> (B, 16)
    assert out.shape == (B, HID_F)
    assert jnp.allclose(out, ref, atol=1e-5, rtol=1e-5), (
        f"max err {jnp.max(jnp.abs(out - ref))}"
    )

    print("KERNEL_OK")
</pallas_src>

<mosaic_0001>
module attributes {stable_mosaic.version = 11 : i64} {
  func.func @_fused_mlp_kernel(%arg0: i32, %arg1: memref<8x10xf32, #tpu.memory_space<vmem>>, %arg2: memref<10x16xf32, #tpu.memory_space<vmem>>, %arg3: memref<8x16xf32, #tpu.memory_space<vmem>>) attributes {dimension_semantics = [#tpu.dimension_semantics<parallel>], iteration_bounds = array<i64: 1>, scalar_prefetch = 0 : i64, scratch_operands = 0 : i64, tpu.core_type = #tpu.core_type<tc>, window_params = [{transform_indices = @transform_0, window_bounds = array<i64: 8, 10>}, {pipeline_mode = #tpu.pipeline_mode<synchronous>, transform_indices = @transform_1, window_bounds = array<i64: 10, 16>}, {transform_indices = @transform_2, window_bounds = array<i64: 8, 16>}]} {
    %c0 = arith.constant 0 : index
    %c0_0 = arith.constant 0 : index
    %0 = vector.load %arg1[%c0, %c0_0] : memref<8x10xf32, #tpu.memory_space<vmem>>, vector<8x10xf32>
    %c0_1 = arith.constant 0 : index
    %c0_2 = arith.constant 0 : index
    %1 = vector.load %arg2[%c0_1, %c0_2] : memref<10x16xf32, #tpu.memory_space<vmem>>, vector<10x16xf32>
    %cst = arith.constant dense<0.000000e+00> : vector<8x16xf32>
    %2 = tpu.matmul %0, %1, %cst {dimension_numbers = #tpu.dot_dimension_numbers<[1], [0], [0], [1], [0, 0, 1, 1], [], []>} : vector<8x10xf32>, vector<10x16xf32>, vector<8x16xf32> -> vector<8x16xf32>
    %c0_3 = arith.constant 0 : index
    %c0_4 = arith.constant 0 : index
    %3 = vector.load %arg3[%c0_3, %c0_4] : memref<8x16xf32, #tpu.memory_space<vmem>>, vector<8x16xf32>
    tpu.vector_store %arg3[%c0_3, %c0_4], %2 {strides = array<i32>} : memref<8x16xf32, #tpu.memory_space<vmem>>, vector<8x16xf32>,
    return
  }
  func.func @transform_0(%arg0: i32) -> (i32, i32) {
    %c0_i32 = arith.constant 0 : i32
    %c0_i32_0 = arith.constant 0 : i32
    return %arg0, %c0_i32 : i32, i32
  }
  func.func @transform_1(%arg0: i32) -> (i32, i32) {
    %c0_i32 = arith.constant 0 : i32
    %c0_i32_0 = arith.constant 0 : i32
    %c0_i32_1 = arith.constant 0 : i32
    return %c0_i32, %c0_i32_0 : i32, i32
  }
  func.func @transform_2(%arg0: i32) -> (i32, i32) {
    %c0_i32 = arith.constant 0 : i32
    %c0_i32_0 = arith.constant 0 : i32
    return %arg0, %c0_i32 : i32, i32
  }
}

</mosaic_0001>

<bundles_post_ra>
// kernel: tpu_custom_call.1
= control target key start
LH: loop header
LB: loop body
LE: loop exit
PB: predicated region body
PF: predicated region fallthrough
CT: control target
= control target key end

     0   :  { %7 = vsyncpa [#allocation3], 0  ;;  %s301_s0 = inlined_call_operand.hbm [shape: f32[8,10], index: 0, kind: input, shape index: {}]   ;;  %s302_s1 = inlined_call_operand.hbm [shape: f32[10,16], index: 1, kind: input, shape index: {}]   ;;  %s303_s2 = inlined_call_operand.hbm [shape: f32[8,16], index: 2, kind: output, shape index: {}]  }
   0x1   :  { %8 = vsyncpa [#allocation6], 0 }
   0x2   :  { %9 = vsyncpa [#allocation4], 0  ;;  %s234_s9 = smov [#allocation2]   ;;  %s235_s11 = smov [#allocation5]  }
   0x3   :  { %s16_s10 = sshll.u32 %s234_s9, 4  ;;  %s25_s12 = sshll.u32 %s235_s11, 4  ;;  %s17_s10 = int_to_ptr.vmem [resolvable:$true] %s16_s10  ;;  %s258_s12 = int_to_ptr.vmem [resolvable:$true] %s25_s12 }
   0x4   :  { %s162_s15 = scalar_lea.hbm %s301_s0, 128 }
   0x5   :  { %p163_p0 = scmp.ne.s32.totalorder %s301_s0, %s162_s15  ;;  %p166_p1 = scmp.lt.u32.totalorder %s162_s15, %s301_s0 }
   0x7   :  { %p168_p2 = pnand %p166_p1, %p163_p0 }
   0x9   :  { %171 = shalt.err (!%p168_p2)
}
   0xa   :  { %s172_s20 = scalar_lea.vmem %s17_s10, 128  ;;  %p177_p4 = scmp.lt.s32.totalorder %s17_s10, %s17_s10 }
   0xb   :  { %p173_p3 = scmp.ne.s32.totalorder %s17_s10, %s172_s20  ;;  %p178_p5 = scmp.lt.s32.totalorder %s172_s20, %s172_s20 }
   0xd   :  { %p179_p6 = por %p178_p5, %p177_p4 }
   0xf   :  { %p180_p7 = pnand %p179_p6, %p173_p3 }
  0x11   :  { %183 = shalt.err (!%p180_p7)
}
  0x12   :  { %19 = dma.hbm_to_vmem [thread:$0]  %s301_s0, 128, %s17_s10, [#allocation3]  }
  0x13   :  { %s184_s25 = scalar_lea.hbm %s302_s1, 256 }
  0x14   :  { %p185_p8 = scmp.ne.s32.totalorder %s302_s1, %s184_s25  ;;  %p188_p9 = scmp.lt.u32.totalorder %s184_s25, %s302_s1 }
  0x16   :  { %p190_p10 = pnand %p188_p9, %p185_p8 }
  0x18   :  { %193 = shalt.err (!%p190_p10)
}
  0x19   :  { %s194_s30 = scalar_lea.vmem %s258_s12, 256  ;;  %p199_p12 = scmp.lt.s32.totalorder %s258_s12, %s258_s12 }
  0x1a   :  { %p195_p11 = scmp.ne.s32.totalorder %s258_s12, %s194_s30  ;;  %p200_p13 = scmp.lt.s32.totalorder %s194_s30, %s194_s30 }
  0x1c   :  { %p201_p0 = por %p200_p13, %p199_p12 }
  0x1e   :  { %p202_p1 = pnand %p201_p0, %p195_p11 }
  0x20   :  { %205 = shalt.err (!%p202_p1)
}
  0x21   :  { %s236_s0 = smov 128   ;;  %s237_s3 = smov 8  }
  0x22   :  { %31 = dma.hbm_to_vmem [thread:$0]  %s302_s1, 256, %s258_s12, [#allocation6], %s236_s0, %s236_s0, %s237_s3  }
  0x23   :  { %228 = dma.done.wait [#allocation3], 128  }
  0x24   :  { %229 = vsyncadd [#allocation3], 4294967168 }
  0x25   :  { %230 = dma.done.wait [#allocation6], 256  }
  0x26   :  { %231 = vsyncadd [#allocation6], 4294967040  ;;  %v238_v0 = vmov 0.0|0.0   ;;  %vm239_vm0 = vmmov 0   ;;  %v240_v1 = vmov 0.0   ;;  %vm45_vm1 = vcmask 1041408  }
  0x27   :  { %149 = vmatprep.subr.bf16.mxu0 %v238_v0  ;;  %146 = vmatprep.mubr.msk.f32.mxu0 %vm239_vm0, %v240_v1  ;;  %v39_v2 = vld [vmem:[#allocation5] sm:$0xff]  ;;  %v40_v3 = vld [vmem:[#allocation5 + $0x8] sm:$0x3]  ;;  %vm241_vm2 = vmmov 1   ;;  %v38_v5 = vld [vmem:[#allocation2] sm:$0xff]  ;;  %vm41_vm4 = vcmask 80896  }
  0x28   :  { %vm151_vm3 = vmpackc.low %vm45_vm1, %vm241_vm2  ;;  %v150_v4 = vpack.c.bf16 %v40_v3, %v39_v2  ;;  %s242_s1 = smov [#allocation7]   ;;  %vm119_vm5 = vcmask 130048  }
  0x29   :  { %s127_s6 = sshll.u32 %s242_s1, 4  ;;  %s128_s6 = int_to_ptr.vmem [resolvable:$true] %s127_s6 }
  0x2a   :  { %152 = vmatpush3.bf16.msk.msra.mxu0 %vm151_vm3, %v150_v4  ;;  %s206_s7 = scalar_lea.vmem %s128_s6, 128  ;;  %p211_p3 = scmp.lt.s32.totalorder %s128_s6, %s128_s6 }
  0x2b   :  { %p207_p2 = scmp.ne.s32.totalorder %s128_s6, %s206_s7  ;;  %p212_p4 = scmp.lt.s32.totalorder %s206_s7, %s206_s7 }
  0x2d   :  { %147 = vmatmul.mubr.msk.f32.vlgmr.msra.gmra.mrb[0].mxu0 %vm41_vm4, %v38_v5  ;;  %p213_p5 = por %p212_p4, %p211_p3 }
  0x2f   :  { %p214_p6 = pnand %p213_p5, %p207_p2 }
 0x100   :  { %v115_v6 = vpop.f32.mrb[0].mxu0 }
 0x101   :  { %v148_v7 = vpop.f32.mrb[1].mxu0  ;;  %120 = vst.msk [vmem:[#allocation7] sm:$0xff] %vm119_vm5, %v115_v6 }
 0x102   :  { %217 = shalt.err (!%p214_p6)
}
 0x103   :  { %s218_s10 = scalar_lea.hbm %s303_s2, 128 }
 0x104   :  { %p219_p7 = scmp.ne.s32.totalorder %s303_s2, %s218_s10  ;;  %p222_p8 = scmp.lt.u32.totalorder %s218_s10, %s303_s2 }
 0x106   :  { %p224_p9 = pnand %p222_p8, %p219_p7 }
 0x108   :  { %227 = shalt.err (!%p224_p9)
}
 0x109   :  { %130 = dma.vmem_to_hbm [thread:$0]  %s128_s6, 128, %s303_s2, [#allocation4]  }
 0x10a   :  { %232 = dma.done.wait [#allocation4], 128  }
 0x10b   :  { %233 = vsyncadd [#allocation4], 4294967168 }
 0x10c   :  { %134 = vsyncpa [#allocation3], 1 }
 0x10d   :  { %135 = vsyncpa [#allocation6], 1 }
 0x10e   :  { %136 = vsyncpa [#allocation4], 1 }

</bundles_post_ra>
